<compile_context>
chip_gen: v7x
topology: tpu7x:2x2x1
jax: 0.10.0
libtpu: 0.0.40
codegen_flags: <defaults>
</compile_context>

<pallas_src>
from collections import OrderedDict
from functools import partial

import jax
import jax.numpy as jnp
from jax.experimental import pallas as pl
from jax.experimental.pallas import tpu as pltpu

PIXELS = "pixls"

NUM_CLASSES = 9          # K: number of body parts (matches Accuracy(num_classes=9))
LABEL_SMOOTHING = 0.1
MAX_ROW_TILE = 32        # max pixel rows (of 128 lanes) per grid step
MAX_BATCH_TILE = 8       # max images per grid step


def _round_up(x, m):
    return ((x + m - 1) // m) * m


def _ce_acc_kernel(s_ref, t_ref, loss_ref, corr_ref, *,
                   num_classes, label_smoothing, hw, tb, ts, need_mask):
    """One grid step.

    s_ref   : (TB, K, TS, 128) scores (storage dtype; upcast per class slab)
    t_ref   : (TB, TS, 128)    int32 targets
    loss_ref: (TB, TS, 128)    f32 per-lane loss partials   (resident over j)
    corr_ref: (TB, TS, 128)    f32 correct-prediction count (resident over j)
    """
    j = pl.program_id(1)

    @pl.when(j == 0)
    def _():
        loss_ref[...] = jnp.zeros_like(loss_ref)
        corr_ref[...] = jnp.zeros_like(corr_ref)

    eps = label_smoothing

    if need_mask:
        row = jax.lax.broadcasted_iota(jnp.int32, (ts, 128), 0)
        lane = jax.lax.broadcasted_iota(jnp.int32, (ts, 128), 1)
        pix = (j * ts + row) * 128 + lane
        valid = pix < hw

    for b in range(tb):
        tgt = t_ref[b, :, :]                                    # (TS, 128) int32

        # Pass 1: per-pixel max + argmax over K classes (unrolled, pure VPU).
        # Strict '>' keeps the first maximal index -> matches torch/jnp argmax.
        m = s_ref[b, 0, :, :].astype(jnp.float32)               # (TS, 128)
        best = jnp.zeros((ts, 128), jnp.int32)
        for c in range(1, num_classes):
            s_c = s_ref[b, c, :, :].astype(jnp.float32)
            take = s_c > m
            m = jnp.where(take, s_c, m)
            best = jnp.where(take, jnp.int32(c), best)

        # Pass 2: softmax statistics accumulated class by class (no iota /
        # one-hot temporaries; only a handful of (TS,128) slabs stay live).
        sum_exp = jnp.zeros((ts, 128), jnp.float32)
        sum_z = jnp.zeros((ts, 128), jnp.float32)
        z_t = jnp.zeros((ts, 128), jnp.float32)
        for c in range(num_classes):
            z_c = s_ref[b, c, :, :].astype(jnp.float32) - m
            sum_exp = sum_exp + jnp.exp(z_c)
            sum_z = sum_z + z_c
            z_t = z_t + jnp.where(tgt == c, z_c, 0.0)

        log_denom = jnp.log(sum_exp)

        # PyTorch CrossEntropyLoss(label_smoothing=eps), folded:
        #   (1-eps)*(log_denom - z_t) + (eps/K)*(K*log_denom - sum_z)
        #     = log_denom - (1-eps)*z_t - (eps/K)*sum_z
        loss_px = log_denom - (1.0 - eps) * z_t - (eps / num_classes) * sum_z
        correct = (best == tgt).astype(jnp.float32)

        if need_mask:
            # Mask BEFORE any accumulation so padded lanes never contribute.
            loss_px = jnp.where(valid, loss_px, 0.0)
            correct = jnp.where(valid, correct, 0.0)

        loss_ref[b, :, :] = loss_ref[b, :, :] + loss_px
        corr_ref[b, :, :] = corr_ref[b, :, :] + correct


@jax.jit
def _pixels_cls_loss_pallas(scores_nchw, targets_nhw):
    """scores: (N, K, H, W) float, targets: (N, H, W) int. Returns (loss, acc)."""
    n, k, h, w = scores_nchw.shape
    hw = h * w

    # Pixel-row tiling: S rows of 128 lanes each.
    s_rows = pl.cdiv(hw, 128)
    if s_rows <= MAX_ROW_TILE:
        ts = s_rows
        s_pad = s_rows
    else:
        s_pad = _round_up(s_rows, 8)
        ts = max(t for t in (32, 24, 16, 8) if s_pad % t == 0)
    hw_pad = s_pad * 128

    # Batch tile: largest divisor of n that is <= MAX_BATCH_TILE.
    tb = 1
    for cand in range(min(MAX_BATCH_TILE, n), 0, -1):
        if n % cand == 0:
            tb = cand
            break

    scores = scores_nchw.reshape(n, k, hw)
    tgts = targets_nhw.reshape(n, hw).astype(jnp.int32)
    if hw_pad != hw:
        scores = jnp.pad(scores, ((0, 0), (0, 0), (0, hw_pad - hw)))
        tgts = jnp.pad(tgts, ((0, 0), (0, hw_pad - hw)))
    scores = scores.reshape(n, k, s_pad, 128)   # dense lanes, K on a leading axis
    tgts = tgts.reshape(n, s_pad, 128)          # dense int32, no sublane padding

    grid = (n // tb, s_pad // ts)

    kernel = partial(_ce_acc_kernel,
                     num_classes=k,
                     label_smoothing=LABEL_SMOOTHING,
                     hw=hw, tb=tb, ts=ts,
                     need_mask=(hw_pad != hw))

    loss_part, corr_part = pl.pallas_call(
        kernel,
        out_shape=(jax.ShapeDtypeStruct((n, ts, 128), jnp.float32),
                   jax.ShapeDtypeStruct((n, ts, 128), jnp.float32)),
        grid_spec=pltpu.PrefetchScalarGridSpec(
            num_scalar_prefetch=0,
            grid=grid,
            in_specs=[
                # (TB, K, TS, 128): dense score slab, K classes unrolled in-kernel.
                pl.BlockSpec((tb, k, ts, 128), lambda i, j: (i, 0, j, 0)),
                # (TB, TS, 128): dense int32 target slab.
                pl.BlockSpec((tb, ts, 128), lambda i, j: (i, j, 0)),
            ],
            out_specs=[
                # Per-batch lane partials, VMEM-resident across the pixel axis.
                pl.BlockSpec((tb, ts, 128), lambda i, j: (i, 0, 0)),
                pl.BlockSpec((tb, ts, 128), lambda i, j: (i, 0, 0)),
            ],
        ),
        compiler_params=pltpu.CompilerParams(
            # Batch axis parallel (shards across v7x's 2 TCs), pixel axis is
            # the accumulation axis.  Default double-buffering is kept.
            dimension_semantics=("parallel", "arbitrary")),
    )(scores, tgts)

    p = jnp.float32(n * hw)
    loss = jnp.sum(loss_part) / p        # CrossEntropyLoss reduction='mean'
    accuracy = jnp.sum(corr_part) / p    # micro top-1 pixel accuracy
    return loss, accuracy


def body_part_attention_loss(pixels_cls_scores, targets):
    """Forward pass of BodyPartAttentionLoss(loss_type='cl', label_smoothing=0.1).

    Args:
        pixels_cls_scores: [N, K, H, W] float scores (NCHW, like PyTorch).
        targets:           [N, H, W] int class labels in [0, K).
    Returns:
        (pixels_cls_loss, loss_summary) matching the PyTorch module.
    """
    loss, accuracy = _pixels_cls_loss_pallas(pixels_cls_scores, targets)

    loss_summary = {PIXELS: OrderedDict()}
    loss_summary[PIXELS]["c"] = loss
    loss_summary[PIXELS]["a"] = accuracy
    return loss, loss_summary


def _reference(pixels_cls_scores, targets):
    """Pure-JAX reference of the PyTorch module (for the sanity check)."""
    n, k, h, w = pixels_cls_scores.shape
    s2 = jnp.transpose(pixels_cls_scores, (0, 2, 3, 1)).reshape(-1, k).astype(jnp.float32)
    t1 = targets.reshape(-1)
    logp = jax.nn.log_softmax(s2, axis=-1)
    nll = -jnp.take_along_axis(logp, t1[:, None].astype(jnp.int32), axis=-1)[:, 0]
    smooth = -jnp.sum(logp, axis=-1)
    eps = LABEL_SMOOTHING
    loss = jnp.mean((1.0 - eps) * nll + (eps / k) * smooth)
    acc = jnp.mean((jnp.argmax(s2, axis=-1) == t1).astype(jnp.float32))
    return loss, acc


if __name__ == "__main__":
    key = jax.random.PRNGKey(0)
    k_scores, k_targets = jax.random.split(key)

    N, K, H, W = 2, NUM_CLASSES, 16, 16
    pixels_cls_scores = jax.random.normal(k_scores, (N, K, H, W), jnp.float32)
    targets = jax.random.randint(k_targets, (N, H, W), 0, K, jnp.int32)

    loss, summary = body_part_attention_loss(pixels_cls_scores, targets)
    acc = summary[PIXELS]["a"]
    jax.block_until_ready(loss)
    jax.block_until_ready(acc)

    # Sanity: finite loss, accuracy in [0, 1], and agreement with pure-JAX ref.
    ref_loss, ref_acc = _reference(pixels_cls_scores, targets)
    assert bool(jnp.isfinite(loss))
    assert 0.0 <= float(acc) <= 1.0
    assert abs(float(loss) - float(ref_loss)) <= 1e-4 + 1e-4 * abs(float(ref_loss))
    assert abs(float(acc) - float(ref_acc)) <= 1e-6

    print("KERNEL_OK")
</pallas_src>

<mosaic_0001>
module attributes {stable_mosaic.version = 11 : i64} {
  func.func @_ce_acc_kernel(%arg0: i32, %arg1: i32, %arg2: memref<2x9x2x128xf32, #tpu.memory_space<vmem>>, %arg3: memref<2x2x128xi32, #tpu.memory_space<vmem>>, %arg4: memref<2x2x128xf32, #tpu.memory_space<vmem>>, %arg5: memref<2x2x128xf32, #tpu.memory_space<vmem>>) attributes {dimension_semantics = [#tpu.dimension_semantics<parallel>, #tpu.dimension_semantics<arbitrary>], iteration_bounds = array<i64: 1, 1>, scalar_prefetch = 0 : i64, scratch_operands = 0 : i64, tpu.core_type = #tpu.core_type<tc>, window_params = [{transform_indices = @transform_0, window_bounds = array<i64: 2, 9, 2, 128>}, {transform_indices = @transform_1, window_bounds = array<i64: 2, 2, 128>}, {transform_indices = @transform_2, window_bounds = array<i64: 2, 2, 128>}, {transform_indices = @transform_3, window_bounds = array<i64: 2, 2, 128>}]} {
    %c0_i32 = arith.constant 0 : i32
    %0 = arith.cmpi eq, %arg1, %c0_i32 : i32
    %1 = arith.extui %0 : i1 to i32
    %c0_i32_0 = arith.constant 0 : i32
    %2 = arith.cmpi ne, %1, %c0_i32_0 : i32
    scf.if %2 {
      %cst_221 = arith.constant 0.000000e+00 : f32
      %357 = vector.broadcast %cst_221 : f32 to vector<2x2x128xf32>
      %c0_222 = arith.constant 0 : index
      %c0_223 = arith.constant 0 : index
      %c0_224 = arith.constant 0 : index
      %358 = vector.load %arg4[%c0_222, %c0_223, %c0_224] : memref<2x2x128xf32, #tpu.memory_space<vmem>>, vector<2x2x128xf32>
      tpu.vector_store %arg4[%c0_222, %c0_223, %c0_224], %357 {strides = array<i32>} : memref<2x2x128xf32, #tpu.memory_space<vmem>>, vector<2x2x128xf32>,
      %cst_225 = arith.constant 0.000000e+00 : f32
      %359 = vector.broadcast %cst_225 : f32 to vector<2x2x128xf32>
      %c0_226 = arith.constant 0 : index
      %c0_227 = arith.constant 0 : index
      %c0_228 = arith.constant 0 : index
      %360 = vector.load %arg5[%c0_226, %c0_227, %c0_228] : memref<2x2x128xf32, #tpu.memory_space<vmem>>, vector<2x2x128xf32>
      tpu.vector_store %arg5[%c0_226, %c0_227, %c0_228], %359 {strides = array<i32>} : memref<2x2x128xf32, #tpu.memory_space<vmem>>, vector<2x2x128xf32>,
    } else {
    }
    %c0 = arith.constant 0 : index
    %c0_1 = arith.constant 0 : index
    %c0_2 = arith.constant 0 : index
    %3 = vector.load %arg3[%c0, %c0_1, %c0_2] : memref<2x2x128xi32, #tpu.memory_space<vmem>>, vector<1x2x128xi32>
    %4 = vector.shape_cast %3 : vector<1x2x128xi32> to vector<2x128xi32>
    %c0_3 = arith.constant 0 : index
    %c0_4 = arith.constant 0 : index
    %c0_5 = arith.constant 0 : index
    %c0_6 = arith.constant 0 : index
    %5 = vector.load %arg2[%c0_3, %c0_4, %c0_5, %c0_6] : memref<2x9x2x128xf32, #tpu.memory_space<vmem>>, vector<1x1x2x128xf32>
    %6 = vector.shape_cast %5 : vector<1x1x2x128xf32> to vector<2x128xf32>
    %c0_i32_7 = arith.constant 0 : i32
    %7 = vector.broadcast %c0_i32_7 : i32 to vector<2x128xi32>
    %c0_8 = arith.constant 0 : index
    %c1 = arith.constant 1 : index
    %c0_9 = arith.constant 0 : index
    %c0_10 = arith.constant 0 : index
    %8 = vector.load %arg2[%c0_8, %c1, %c0_9, %c0_10] : memref<2x9x2x128xf32, #tpu.memory_space<vmem>>, vector<1x1x2x128xf32>
    %9 = vector.shape_cast %8 : vector<1x1x2x128xf32> to vector<2x128xf32>
    %10 = arith.cmpf ogt, %9, %6 : vector<2x128xf32>
    %11 = arith.select %10, %9, %6 : vector<2x128xi1>, vector<2x128xf32>
    %c1_i32 = arith.constant 1 : i32
    %12 = vector.broadcast %c1_i32 : i32 to vector<2x128xi32>
    %13 = arith.select %10, %12, %7 : vector<2x128xi1>, vector<2x128xi32>
    %c0_11 = arith.constant 0 : index
    %c2 = arith.constant 2 : index
    %c0_12 = arith.constant 0 : index
    %c0_13 = arith.constant 0 : index
    %14 = vector.load %arg2[%c0_11, %c2, %c0_12, %c0_13] : memref<2x9x2x128xf32, #tpu.memory_space<vmem>>, vector<1x1x2x128xf32>
    %15 = vector.shape_cast %14 : vector<1x1x2x128xf32> to vector<2x128xf32>
    %16 = arith.cmpf ogt, %15, %11 : vector<2x128xf32>
    %17 = arith.select %16, %15, %11 : vector<2x128xi1>, vector<2x128xf32>
    %c2_i32 = arith.constant 2 : i32
    %18 = vector.broadcast %c2_i32 : i32 to vector<2x128xi32>
    %19 = arith.select %16, %18, %13 : vector<2x128xi1>, vector<2x128xi32>
    %c0_14 = arith.constant 0 : index
    %c3 = arith.constant 3 : index
    %c0_15 = arith.constant 0 : index
    %c0_16 = arith.constant 0 : index
    %20 = vector.load %arg2[%c0_14, %c3, %c0_15, %c0_16] : memref<2x9x2x128xf32, #tpu.memory_space<vmem>>, vector<1x1x2x128xf32>
    %21 = vector.shape_cast %20 : vector<1x1x2x128xf32> to vector<2x128xf32>
    %22 = arith.cmpf ogt, %21, %17 : vector<2x128xf32>
    %23 = arith.select %22, %21, %17 : vector<2x128xi1>, vector<2x128xf32>
    %c3_i32 = arith.constant 3 : i32
    %24 = vector.broadcast %c3_i32 : i32 to vector<2x128xi32>
    %25 = arith.select %22, %24, %19 : vector<2x128xi1>, vector<2x128xi32>
    %c0_17 = arith.constant 0 : index
    %c4 = arith.constant 4 : index
    %c0_18 = arith.constant 0 : index
    %c0_19 = arith.constant 0 : index
    %26 = vector.load %arg2[%c0_17, %c4, %c0_18, %c0_19] : memref<2x9x2x128xf32, #tpu.memory_space<vmem>>, vector<1x1x2x128xf32>
    %27 = vector.shape_cast %26 : vector<1x1x2x128xf32> to vector<2x128xf32>
    %28 = arith.cmpf ogt, %27, %23 : vector<2x128xf32>
    %29 = arith.select %28, %27, %23 : vector<2x128xi1>, vector<2x128xf32>
    %c4_i32 = arith.constant 4 : i32
    %30 = vector.broadcast %c4_i32 : i32 to vector<2x128xi32>
    %31 = arith.select %28, %30, %25 : vector<2x128xi1>, vector<2x128xi32>
    %c0_20 = arith.constant 0 : index
    %c5 = arith.constant 5 : index
    %c0_21 = arith.constant 0 : index
    %c0_22 = arith.constant 0 : index
    %32 = vector.load %arg2[%c0_20, %c5, %c0_21, %c0_22] : memref<2x9x2x128xf32, #tpu.memory_space<vmem>>, vector<1x1x2x128xf32>
    %33 = vector.shape_cast %32 : vector<1x1x2x128xf32> to vector<2x128xf32>
    %34 = arith.cmpf ogt, %33, %29 : vector<2x128xf32>
    %35 = arith.select %34, %33, %29 : vector<2x128xi1>, vector<2x128xf32>
    %c5_i32 = arith.constant 5 : i32
    %36 = vector.broadcast %c5_i32 : i32 to vector<2x128xi32>
    %37 = arith.select %34, %36, %31 : vector<2x128xi1>, vector<2x128xi32>
    %c0_23 = arith.constant 0 : index
    %c6 = arith.constant 6 : index
    %c0_24 = arith.constant 0 : index
    %c0_25 = arith.constant 0 : index
    %38 = vector.load %arg2[%c0_23, %c6, %c0_24, %c0_25] : memref<2x9x2x128xf32, #tpu.memory_space<vmem>>, vector<1x1x2x128xf32>
    %39 = vector.shape_cast %38 : vector<1x1x2x128xf32> to vector<2x128xf32>
    %40 = arith.cmpf ogt, %39, %35 : vector<2x128xf32>
    %41 = arith.select %40, %39, %35 : vector<2x128xi1>, vector<2x128xf32>
    %c6_i32 = arith.constant 6 : i32
    %42 = vector.broadcast %c6_i32 : i32 to vector<2x128xi32>
    %43 = arith.select %40, %42, %37 : vector<2x128xi1>, vector<2x128xi32>
    %c0_26 = arith.constant 0 : index
    %c7 = arith.constant 7 : index
    %c0_27 = arith.constant 0 : index
    %c0_28 = arith.constant 0 : index
    %44 = vector.load %arg2[%c0_26, %c7, %c0_27, %c0_28] : memref<2x9x2x128xf32, #tpu.memory_space<vmem>>, vector<1x1x2x128xf32>
    %45 = vector.shape_cast %44 : vector<1x1x2x128xf32> to vector<2x128xf32>
    %46 = arith.cmpf ogt, %45, %41 : vector<2x128xf32>
    %47 = arith.select %46, %45, %41 : vector<2x128xi1>, vector<2x128xf32>
    %c7_i32 = arith.constant 7 : i32
    %48 = vector.broadcast %c7_i32 : i32 to vector<2x128xi32>
    %49 = arith.select %46, %48, %43 : vector<2x128xi1>, vector<2x128xi32>
    %c0_29 = arith.constant 0 : index
    %c8 = arith.constant 8 : index
    %c0_30 = arith.constant 0 : index
    %c0_31 = arith.constant 0 : index
    %50 = vector.load %arg2[%c0_29, %c8, %c0_30, %c0_31] : memref<2x9x2x128xf32, #tpu.memory_space<vmem>>, vector<1x1x2x128xf32>
    %51 = vector.shape_cast %50 : vector<1x1x2x128xf32> to vector<2x128xf32>
    %52 = arith.cmpf ogt, %51, %47 : vector<2x128xf32>
    %53 = arith.select %52, %51, %47 : vector<2x128xi1>, vector<2x128xf32>
    %c8_i32 = arith.constant 8 : i32
    %54 = vector.broadcast %c8_i32 : i32 to vector<2x128xi32>
    %55 = arith.select %52, %54, %49 : vector<2x128xi1>, vector<2x128xi32>
    %cst = arith.constant 0.000000e+00 : f32
    %56 = vector.broadcast %cst : f32 to vector<2x128xf32>
    %cst_32 = arith.constant 0.000000e+00 : f32
    %57 = vector.broadcast %cst_32 : f32 to vector<2x128xf32>
    %cst_33 = arith.constant 0.000000e+00 : f32
    %58 = vector.broadcast %cst_33 : f32 to vector<2x128xf32>
    %c0_34 = arith.constant 0 : index
    %c0_35 = arith.constant 0 : index
    %c0_36 = arith.constant 0 : index
    %c0_37 = arith.constant 0 : index
    %59 = vector.load %arg2[%c0_34, %c0_35, %c0_36, %c0_37] : memref<2x9x2x128xf32, #tpu.memory_space<vmem>>, vector<1x1x2x128xf32>
    %60 = vector.shape_cast %59 : vector<1x1x2x128xf32> to vector<2x128xf32>
    %61 = arith.subf %60, %53 : vector<2x128xf32>
    %62 = math.exp %61 : vector<2x128xf32>
    %63 = arith.addf %56, %62 : vector<2x128xf32>
    %64 = arith.addf %57, %61 : vector<2x128xf32>
    %c0_i32_38 = arith.constant 0 : i32
    %65 = vector.broadcast %c0_i32_38 : i32 to vector<2x128xi32>
    %66 = arith.cmpi eq, %4, %65 : vector<2x128xi32>
    %cst_39 = arith.constant 0.000000e+00 : f32
    %67 = vector.broadcast %cst_39 : f32 to vector<2x128xf32>
    %68 = arith.select %66, %61, %67 : vector<2x128xi1>, vector<2x128xf32>
    %69 = arith.addf %58, %68 : vector<2x128xf32>
    %c0_40 = arith.constant 0 : index
    %c1_41 = arith.constant 1 : index
    %c0_42 = arith.constant 0 : index
    %c0_43 = arith.constant 0 : index
    %70 = vector.load %arg2[%c0_40, %c1_41, %c0_42, %c0_43] : memref<2x9x2x128xf32, #tpu.memory_space<vmem>>, vector<1x1x2x128xf32>
    %71 = vector.shape_cast %70 : vector<1x1x2x128xf32> to vector<2x128xf32>
    %72 = arith.subf %71, %53 : vector<2x128xf32>
    %73 = math.exp %72 : vector<2x128xf32>
    %74 = arith.addf %63, %73 : vector<2x128xf32>
    %75 = arith.addf %64, %72 : vector<2x128xf32>
    %c1_i32_44 = arith.constant 1 : i32
    %76 = vector.broadcast %c1_i32_44 : i32 to vector<2x128xi32>
    %77 = arith.cmpi eq, %4, %76 : vector<2x128xi32>
    %cst_45 = arith.constant 0.000000e+00 : f32
    %78 = vector.broadcast %cst_45 : f32 to vector<2x128xf32>
    %79 = arith.select %77, %72, %78 : vector<2x128xi1>, vector<2x128xf32>
    %80 = arith.addf %69, %79 : vector<2x128xf32>
    %c0_46 = arith.constant 0 : index
    %c2_47 = arith.constant 2 : index
    %c0_48 = arith.constant 0 : index
    %c0_49 = arith.constant 0 : index
    %81 = vector.load %arg2[%c0_46, %c2_47, %c0_48, %c0_49] : memref<2x9x2x128xf32, #tpu.memory_space<vmem>>, vector<1x1x2x128xf32>
    %82 = vector.shape_cast %81 : vector<1x1x2x128xf32> to vector<2x128xf32>
    %83 = arith.subf %82, %53 : vector<2x128xf32>
    %84 = math.exp %83 : vector<2x128xf32>
    %85 = arith.addf %74, %84 : vector<2x128xf32>
    %86 = arith.addf %75, %83 : vector<2x128xf32>
    %c2_i32_50 = arith.constant 2 : i32
    %87 = vector.broadcast %c2_i32_50 : i32 to vector<2x128xi32>
    %88 = arith.cmpi eq, %4, %87 : vector<2x128xi32>
    %cst_51 = arith.constant 0.000000e+00 : f32
    %89 = vector.broadcast %cst_51 : f32 to vector<2x128xf32>
    %90 = arith.select %88, %83, %89 : vector<2x128xi1>, vector<2x128xf32>
    %91 = arith.addf %80, %90 : vector<2x128xf32>
    %c0_52 = arith.constant 0 : index
    %c3_53 = arith.constant 3 : index
    %c0_54 = arith.constant 0 : index
    %c0_55 = arith.constant 0 : index
    %92 = vector.load %arg2[%c0_52, %c3_53, %c0_54, %c0_55] : memref<2x9x2x128xf32, #tpu.memory_space<vmem>>, vector<1x1x2x128xf32>
    %93 = vector.shape_cast %92 : vector<1x1x2x128xf32> to vector<2x128xf32>
    %94 = arith.subf %93, %53 : vector<2x128xf32>
    %95 = math.exp %94 : vector<2x128xf32>
    %96 = arith.addf %85, %95 : vector<2x128xf32>
    %97 = arith.addf %86, %94 : vector<2x128xf32>
    %c3_i32_56 = arith.constant 3 : i32
    %98 = vector.broadcast %c3_i32_56 : i32 to vector<2x128xi32>
    %99 = arith.cmpi eq, %4, %98 : vector<2x128xi32>
    %cst_57 = arith.constant 0.000000e+00 : f32
    %100 = vector.broadcast %cst_57 : f32 to vector<2x128xf32>
    %101 = arith.select %99, %94, %100 : vector<2x128xi1>, vector<2x128xf32>
    %102 = arith.addf %91, %101 : vector<2x128xf32>
    %c0_58 = arith.constant 0 : index
    %c4_59 = arith.constant 4 : index
    %c0_60 = arith.constant 0 : index
    %c0_61 = arith.constant 0 : index
    %103 = vector.load %arg2[%c0_58, %c4_59, %c0_60, %c0_61] : memref<2x9x2x128xf32, #tpu.memory_space<vmem>>, vector<1x1x2x128xf32>
    %104 = vector.shape_cast %103 : vector<1x1x2x128xf32> to vector<2x128xf32>
    %105 = arith.subf %104, %53 : vector<2x128xf32>
    %106 = math.exp %105 : vector<2x128xf32>
    %107 = arith.addf %96, %106 : vector<2x128xf32>
    %108 = arith.addf %97, %105 : vector<2x128xf32>
    %c4_i32_62 = arith.constant 4 : i32
    %109 = vector.broadcast %c4_i32_62 : i32 to vector<2x128xi32>
    %110 = arith.cmpi eq, %4, %109 : vector<2x128xi32>
    %cst_63 = arith.constant 0.000000e+00 : f32
    %111 = vector.broadcast %cst_63 : f32 to vector<2x128xf32>
    %112 = arith.select %110, %105, %111 : vector<2x128xi1>, vector<2x128xf32>
    %113 = arith.addf %102, %112 : vector<2x128xf32>
    %c0_64 = arith.constant 0 : index
    %c5_65 = arith.constant 5 : index
    %c0_66 = arith.constant 0 : index
    %c0_67 = arith.constant 0 : index
    %114 = vector.load %arg2[%c0_64, %c5_65, %c0_66, %c0_67] : memref<2x9x2x128xf32, #tpu.memory_space<vmem>>, vector<1x1x2x128xf32>
    %115 = vector.shape_cast %114 : vector<1x1x2x128xf32> to vector<2x128xf32>
    %116 = arith.subf %115, %53 : vector<2x128xf32>
    %117 = math.exp %116 : vector<2x128xf32>
    %118 = arith.addf %107, %117 : vector<2x128xf32>
    %119 = arith.addf %108, %116 : vector<2x128xf32>
    %c5_i32_68 = arith.constant 5 : i32
    %120 = vector.broadcast %c5_i32_68 : i32 to vector<2x128xi32>
    %121 = arith.cmpi eq, %4, %120 : vector<2x128xi32>
    %cst_69 = arith.constant 0.000000e+00 : f32
    %122 = vector.broadcast %cst_69 : f32 to vector<2x128xf32>
    %123 = arith.select %121, %116, %122 : vector<2x128xi1>, vector<2x128xf32>
    %124 = arith.addf %113, %123 : vector<2x128xf32>
    %c0_70 = arith.constant 0 : index
    %c6_71 = arith.constant 6 : index
    %c0_72 = arith.constant 0 : index
    %c0_73 = arith.constant 0 : index
    %125 = vector.load %arg2[%c0_70, %c6_71, %c0_72, %c0_73] : memref<2x9x2x128xf32, #tpu.memory_space<vmem>>, vector<1x1x2x128xf32>
    %126 = vector.shape_cast %125 : vector<1x1x2x128xf32> to vector<2x128xf32>
    %127 = arith.subf %126, %53 : vector<2x128xf32>
    %128 = math.exp %127 : vector<2x128xf32>
    %129 = arith.addf %118, %128 : vector<2x128xf32>
    %130 = arith.addf %119, %127 : vector<2x128xf32>
    %c6_i32_74 = arith.constant 6 : i32
    %131 = vector.broadcast %c6_i32_74 : i32 to vector<2x128xi32>
    %132 = arith.cmpi eq, %4, %131 : vector<2x128xi32>
    %cst_75 = arith.constant 0.000000e+00 : f32
    %133 = vector.broadcast %cst_75 : f32 to vector<2x128xf32>
    %134 = arith.select %132, %127, %133 : vector<2x128xi1>, vector<2x128xf32>
    %135 = arith.addf %124, %134 : vector<2x128xf32>
    %c0_76 = arith.constant 0 : index
    %c7_77 = arith.constant 7 : index
    %c0_78 = arith.constant 0 : index
    %c0_79 = arith.constant 0 : index
    %136 = vector.load %arg2[%c0_76, %c7_77, %c0_78, %c0_79] : memref<2x9x2x128xf32, #tpu.memory_space<vmem>>, vector<1x1x2x128xf32>
    %137 = vector.shape_cast %136 : vector<1x1x2x128xf32> to vector<2x128xf32>
    %138 = arith.subf %137, %53 : vector<2x128xf32>
    %139 = math.exp %138 : vector<2x128xf32>
    %140 = arith.addf %129, %139 : vector<2x128xf32>
    %141 = arith.addf %130, %138 : vector<2x128xf32>
    %c7_i32_80 = arith.constant 7 : i32
    %142 = vector.broadcast %c7_i32_80 : i32 to vector<2x128xi32>
    %143 = arith.cmpi eq, %4, %142 : vector<2x128xi32>
    %cst_81 = arith.constant 0.000000e+00 : f32
    %144 = vector.broadcast %cst_81 : f32 to vector<2x128xf32>
    %145 = arith.select %143, %138, %144 : vector<2x128xi1>, vector<2x128xf32>
    %146 = arith.addf %135, %145 : vector<2x128xf32>
    %c0_82 = arith.constant 0 : index
    %c8_83 = arith.constant 8 : index
    %c0_84 = arith.constant 0 : index
    %c0_85 = arith.constant 0 : index
    %147 = vector.load %arg2[%c0_82, %c8_83, %c0_84, %c0_85] : memref<2x9x2x128xf32, #tpu.memory_space<vmem>>, vector<1x1x2x128xf32>
    %148 = vector.shape_cast %147 : vector<1x1x2x128xf32> to vector<2x128xf32>
    %149 = arith.subf %148, %53 : vector<2x128xf32>
    %150 = math.exp %149 : vector<2x128xf32>
    %151 = arith.addf %140, %150 : vector<2x128xf32>
    %152 = arith.addf %141, %149 : vector<2x128xf32>
    %c8_i32_86 = arith.constant 8 : i32
    %153 = vector.broadcast %c8_i32_86 : i32 to vector<2x128xi32>
    %154 = arith.cmpi eq, %4, %153 : vector<2x128xi32>
    %cst_87 = arith.constant 0.000000e+00 : f32
    %155 = vector.broadcast %cst_87 : f32 to vector<2x128xf32>
    %156 = arith.select %154, %149, %155 : vector<2x128xi1>, vector<2x128xf32>
    %157 = arith.addf %146, %156 : vector<2x128xf32>
    %158 = math.log %151 : vector<2x128xf32>
    %cst_88 = arith.constant 0.899999976 : f32
    %159 = vector.broadcast %cst_88 : f32 to vector<2x128xf32>
    %160 = arith.mulf %159, %157 : vector<2x128xf32>
    %161 = arith.subf %158, %160 : vector<2x128xf32>
    %cst_89 = arith.constant 0.0111111114 : f32
    %162 = vector.broadcast %cst_89 : f32 to vector<2x128xf32>
    %163 = arith.mulf %162, %152 : vector<2x128xf32>
    %164 = arith.subf %161, %163 : vector<2x128xf32>
    %165 = arith.cmpi eq, %55, %4 : vector<2x128xi32>
    %166 = arith.extui %165 : vector<2x128xi1> to vector<2x128xi32>
    %167 = arith.sitofp %166 : vector<2x128xi32> to vector<2x128xf32>
    %c0_90 = arith.constant 0 : index
    %c0_91 = arith.constant 0 : index
    %c0_92 = arith.constant 0 : index
    %168 = vector.load %arg4[%c0_90, %c0_91, %c0_92] : memref<2x2x128xf32, #tpu.memory_space<vmem>>, vector<1x2x128xf32>
    %169 = vector.shape_cast %168 : vector<1x2x128xf32> to vector<2x128xf32>
    %170 = arith.addf %169, %164 : vector<2x128xf32>
    %c0_93 = arith.constant 0 : index
    %c0_94 = arith.constant 0 : index
    %c0_95 = arith.constant 0 : index
    %171 = vector.load %arg4[%c0_93, %c0_94, %c0_95] : memref<2x2x128xf32, #tpu.memory_space<vmem>>, vector<1x2x128xf32>
    %172 = vector.shape_cast %171 : vector<1x2x128xf32> to vector<2x128xf32>
    %173 = vector.shape_cast %170 : vector<2x128xf32> to vector<1x2x128xf32>
    tpu.vector_store %arg4[%c0_93, %c0_94, %c0_95], %173 {strides = array<i32>} : memref<2x2x128xf32, #tpu.memory_space<vmem>>, vector<1x2x128xf32>,
    %c0_96 = arith.constant 0 : index
    %c0_97 = arith.constant 0 : index
    %c0_98 = arith.constant 0 : index
    %174 = vector.load %arg5[%c0_96, %c0_97, %c0_98] : memref<2x2x128xf32, #tpu.memory_space<vmem>>, vector<1x2x128xf32>
    %175 = vector.shape_cast %174 : vector<1x2x128xf32> to vector<2x128xf32>
    %176 = arith.addf %175, %167 : vector<2x128xf32>
    %c0_99 = arith.constant 0 : index
    %c0_100 = arith.constant 0 : index
    %c0_101 = arith.constant 0 : index
    %177 = vector.load %arg5[%c0_99, %c0_100, %c0_101] : memref<2x2x128xf32, #tpu.memory_space<vmem>>, vector<1x2x128xf32>
    %178 = vector.shape_cast %177 : vector<1x2x128xf32> to vector<2x128xf32>
    %179 = vector.shape_cast %176 : vector<2x128xf32> to vector<1x2x128xf32>
    tpu.vector_store %arg5[%c0_99, %c0_100, %c0_101], %179 {strides = array<i32>} : memref<2x2x128xf32, #tpu.memory_space<vmem>>, vector<1x2x128xf32>,
    %c1_102 = arith.constant 1 : index
    %c0_103 = arith.constant 0 : index
    %c0_104 = arith.constant 0 : index
    %180 = vector.load %arg3[%c1_102, %c0_103, %c0_104] : memref<2x2x128xi32, #tpu.memory_space<vmem>>, vector<1x2x128xi32>
    %181 = vector.shape_cast %180 : vector<1x2x128xi32> to vector<2x128xi32>
    %c1_105 = arith.constant 1 : index
    %c0_106 = arith.constant 0 : index
    %c0_107 = arith.constant 0 : index
    %c0_108 = arith.constant 0 : index
    %182 = vector.load %arg2[%c1_105, %c0_106, %c0_107, %c0_108] : memref<2x9x2x128xf32, #tpu.memory_space<vmem>>, vector<1x1x2x128xf32>
    %183 = vector.shape_cast %182 : vector<1x1x2x128xf32> to vector<2x128xf32>
    %c0_i32_109 = arith.constant 0 : i32
    %184 = vector.broadcast %c0_i32_109 : i32 to vector<2x128xi32>
    %c1_110 = arith.constant 1 : index
    %c1_111 = arith.constant 1 : index
    %c0_112 = arith.constant 0 : index
    %c0_113 = arith.constant 0 : index
    %185 = vector.load %arg2[%c1_110, %c1_111, %c0_112, %c0_113] : memref<2x9x2x128xf32, #tpu.memory_space<vmem>>, vector<1x1x2x128xf32>
    %186 = vector.shape_cast %185 : vector<1x1x2x128xf32> to vector<2x128xf32>
    %187 = arith.cmpf ogt, %186, %183 : vector<2x128xf32>
    %188 = arith.select %187, %186, %183 : vector<2x128xi1>, vector<2x128xf32>
    %c1_i32_114 = arith.constant 1 : i32
    %189 = vector.broadcast %c1_i32_114 : i32 to vector<2x128xi32>
    %190 = arith.select %187, %189, %184 : vector<2x128xi1>, vector<2x128xi32>
    %c1_115 = arith.constant 1 : index
    %c2_116 = arith.constant 2 : index
    %c0_117 = arith.constant 0 : index
    %c0_118 = arith.constant 0 : index
    %191 = vector.load %arg2[%c1_115, %c2_116, %c0_117, %c0_118] : memref<2x9x2x128xf32, #tpu.memory_space<vmem>>, vector<1x1x2x128xf32>
    %192 = vector.shape_cast %191 : vector<1x1x2x128xf32> to vector<2x128xf32>
    %193 = arith.cmpf ogt, %192, %188 : vector<2x128xf32>
    %194 = arith.select %193, %192, %188 : vector<2x128xi1>, vector<2x128xf32>
    %c2_i32_119 = arith.constant 2 : i32
    %195 = vector.broadcast %c2_i32_119 : i32 to vector<2x128xi32>
    %196 = arith.select %193, %195, %190 : vector<2x128xi1>, vector<2x128xi32>
    %c1_120 = arith.constant 1 : index
    %c3_121 = arith.constant 3 : index
    %c0_122 = arith.constant 0 : index
    %c0_123 = arith.constant 0 : index
    %197 = vector.load %arg2[%c1_120, %c3_121, %c0_122, %c0_123] : memref<2x9x2x128xf32, #tpu.memory_space<vmem>>, vector<1x1x2x128xf32>
    %198 = vector.shape_cast %197 : vector<1x1x2x128xf32> to vector<2x128xf32>
    %199 = arith.cmpf ogt, %198, %194 : vector<2x128xf32>
    %200 = arith.select %199, %198, %194 : vector<2x128xi1>, vector<2x128xf32>
    %c3_i32_124 = arith.constant 3 : i32
    %201 = vector.broadcast %c3_i32_124 : i32 to vector<2x128xi32>
    %202 = arith.select %199, %201, %196 : vector<2x128xi1>, vector<2x128xi32>
    %c1_125 = arith.constant 1 : index
    %c4_126 = arith.constant 4 : index
    %c0_127 = arith.constant 0 : index
    %c0_128 = arith.constant 0 : index
    %203 = vector.load %arg2[%c1_125, %c4_126, %c0_127, %c0_128] : memref<2x9x2x128xf32, #tpu.memory_space<vmem>>, vector<1x1x2x128xf32>
    %204 = vector.shape_cast %203 : vector<1x1x2x128xf32> to vector<2x128xf32>
    %205 = arith.cmpf ogt, %204, %200 : vector<2x128xf32>
    %206 = arith.select %205, %204, %200 : vector<2x128xi1>, vector<2x128xf32>
    %c4_i32_129 = arith.constant 4 : i32
    %207 = vector.broadcast %c4_i32_129 : i32 to vector<2x128xi32>
    %208 = arith.select %205, %207, %202 : vector<2x128xi1>, vector<2x128xi32>
    %c1_130 = arith.constant 1 : index
    %c5_131 = arith.constant 5 : index
    %c0_132 = arith.constant 0 : index
    %c0_133 = arith.constant 0 : index
    %209 = vector.load %arg2[%c1_130, %c5_131, %c0_132, %c0_133] : memref<2x9x2x128xf32, #tpu.memory_space<vmem>>, vector<1x1x2x128xf32>
    %210 = vector.shape_cast %209 : vector<1x1x2x128xf32> to vector<2x128xf32>
    %211 = arith.cmpf ogt, %210, %206 : vector<2x128xf32>
    %212 = arith.select %211, %210, %206 : vector<2x128xi1>, vector<2x128xf32>
    %c5_i32_134 = arith.constant 5 : i32
    %213 = vector.broadcast %c5_i32_134 : i32 to vector<2x128xi32>
    %214 = arith.select %211, %213, %208 : vector<2x128xi1>, vector<2x128xi32>
    %c1_135 = arith.constant 1 : index
    %c6_136 = arith.constant 6 : index
    %c0_137 = arith.constant 0 : index
    %c0_138 = arith.constant 0 : index
    %215 = vector.load %arg2[%c1_135, %c6_136, %c0_137, %c0_138] : memref<2x9x2x128xf32, #tpu.memory_space<vmem>>, vector<1x1x2x128xf32>
    %216 = vector.shape_cast %215 : vector<1x1x2x128xf32> to vector<2x128xf32>
    %217 = arith.cmpf ogt, %216, %212 : vector<2x128xf32>
    %218 = arith.select %217, %216, %212 : vector<2x128xi1>, vector<2x128xf32>
    %c6_i32_139 = arith.constant 6 : i32
    %219 = vector.broadcast %c6_i32_139 : i32 to vector<2x128xi32>
    %220 = arith.select %217, %219, %214 : vector<2x128xi1>, vector<2x128xi32>
    %c1_140 = arith.constant 1 : index
    %c7_141 = arith.constant 7 : index
    %c0_142 = arith.constant 0 : index
    %c0_143 = arith.constant 0 : index
    %221 = vector.load %arg2[%c1_140, %c7_141, %c0_142, %c0_143] : memref<2x9x2x128xf32, #tpu.memory_space<vmem>>, vector<1x1x2x128xf32>
    %222 = vector.shape_cast %221 : vector<1x1x2x128xf32> to vector<2x128xf32>
    %223 = arith.cmpf ogt, %222, %218 : vector<2x128xf32>
    %224 = arith.select %223, %222, %218 : vector<2x128xi1>, vector<2x128xf32>
    %c7_i32_144 = arith.constant 7 : i32
    %225 = vector.broadcast %c7_i32_144 : i32 to vector<2x128xi32>
    %226 = arith.select %223, %225, %220 : vector<2x128xi1>, vector<2x128xi32>
    %c1_145 = arith.constant 1 : index
    %c8_146 = arith.constant 8 : index
    %c0_147 = arith.constant 0 : index
    %c0_148 = arith.constant 0 : index
    %227 = vector.load %arg2[%c1_145, %c8_146, %c0_147, %c0_148] : memref<2x9x2x128xf32, #tpu.memory_space<vmem>>, vector<1x1x2x128xf32>
    %228 = vector.shape_cast %227 : vector<1x1x2x128xf32> to vector<2x128xf32>
    %229 = arith.cmpf ogt, %228, %224 : vector<2x128xf32>
    %230 = arith.select %229, %228, %224 : vector<2x128xi1>, vector<2x128xf32>
    %c8_i32_149 = arith.constant 8 : i32
    %231 = vector.broadcast %c8_i32_149 : i32 to vector<2x128xi32>
    %232 = arith.select %229, %231, %226 : vector<2x128xi1>, vector<2x128xi32>
    %cst_150 = arith.constant 0.000000e+00 : f32
    %233 = vector.broadcast %cst_150 : f32 to vector<2x128xf32>
    %cst_151 = arith.constant 0.000000e+00 : f32
    %234 = vector.broadcast %cst_151 : f32 to vector<2x128xf32>
    %cst_152 = arith.constant 0.000000e+00 : f32
    %235 = vector.broadcast %cst_152 : f32 to vector<2x128xf32>
    %c1_153 = arith.constant 1 : index
    %c0_154 = arith.constant 0 : index
    %c0_155 = arith.constant 0 : index
    %c0_156 = arith.constant 0 : index
    %236 = vector.load %arg2[%c1_153, %c0_154, %c0_155, %c0_156] : memref<2x9x2x128xf32, #tpu.memory_space<vmem>>, vector<1x1x2x128xf32>
    %237 = vector.shape_cast %236 : vector<1x1x2x128xf32> to vector<2x128xf32>
    %238 = arith.subf %237, %230 : vector<2x128xf32>
    %239 = math.exp %238 : vector<2x128xf32>
    %240 = arith.addf %233, %239 : vector<2x128xf32>
    %241 = arith.addf %234, %238 : vector<2x128xf32>
    %c0_i32_157 = arith.constant 0 : i32
    %242 = vector.broadcast %c0_i32_157 : i32 to vector<2x128xi32>
    %243 = arith.cmpi eq, %181, %242 : vector<2x128xi32>
    %cst_158 = arith.constant 0.000000e+00 : f32
    %244 = vector.broadcast %cst_158 : f32 to vector<2x128xf32>
    %245 = arith.select %243, %238, %244 : vector<2x128xi1>, vector<2x128xf32>
    %246 = arith.addf %235, %245 : vector<2x128xf32>
    %c1_159 = arith.constant 1 : index
    %c1_160 = arith.constant 1 : index
    %c0_161 = arith.constant 0 : index
    %c0_162 = arith.constant 0 : index
    %247 = vector.load %arg2[%c1_159, %c1_160, %c0_161, %c0_162] : memref<2x9x2x128xf32, #tpu.memory_space<vmem>>, vector<1x1x2x128xf32>
    %248 = vector.shape_cast %247 : vector<1x1x2x128xf32> to vector<2x128xf32>
    %249 = arith.subf %248, %230 : vector<2x128xf32>
    %250 = math.exp %249 : vector<2x128xf32>
    %251 = arith.addf %240, %250 : vector<2x128xf32>
    %252 = arith.addf %241, %249 : vector<2x128xf32>
    %c1_i32_163 = arith.constant 1 : i32
    %253 = vector.broadcast %c1_i32_163 : i32 to vector<2x128xi32>
    %254 = arith.cmpi eq, %181, %253 : vector<2x128xi32>
    %cst_164 = arith.constant 0.000000e+00 : f32
    %255 = vector.broadcast %cst_164 : f32 to vector<2x128xf32>
    %256 = arith.select %254, %249, %255 : vector<2x128xi1>, vector<2x128xf32>
    %257 = arith.addf %246, %256 : vector<2x128xf32>
    %c1_165 = arith.constant 1 : index
    %c2_166 = arith.constant 2 : index
    %c0_167 = arith.constant 0 : index
    %c0_168 = arith.constant 0 : index
    %258 = vector.load %arg2[%c1_165, %c2_166, %c0_167, %c0_168] : memref<2x9x2x128xf32, #tpu.memory_space<vmem>>, vector<1x1x2x128xf32>
    %259 = vector.shape_cast %258 : vector<1x1x2x128xf32> to vector<2x128xf32>
    %260 = arith.subf %259, %230 : vector<2x128xf32>
    %261 = math.exp %260 : vector<2x128xf32>
    %262 = arith.addf %251, %261 : vector<2x128xf32>
    %263 = arith.addf %252, %260 : vector<2x128xf32>
    %c2_i32_169 = arith.constant 2 : i32
    %264 = vector.broadcast %c2_i32_169 : i32 to vector<2x128xi32>
    %265 = arith.cmpi eq, %181, %264 : vector<2x128xi32>
    %cst_170 = arith.constant 0.000000e+00 : f32
    %266 = vector.broadcast %cst_170 : f32 to vector<2x128xf32>
    %267 = arith.select %265, %260, %266 : vector<2x128xi1>, vector<2x128xf32>
    %268 = arith.addf %257, %267 : vector<2x128xf32>
    %c1_171 = arith.constant 1 : index
    %c3_172 = arith.constant 3 : index
    %c0_173 = arith.constant 0 : index
    %c0_174 = arith.constant 0 : index
    %269 = vector.load %arg2[%c1_171, %c3_172, %c0_173, %c0_174] : memref<2x9x2x128xf32, #tpu.memory_space<vmem>>, vector<1x1x2x128xf32>
    %270 = vector.shape_cast %269 : vector<1x1x2x128xf32> to vector<2x128xf32>
    %271 = arith.subf %270, %230 : vector<2x128xf32>
    %272 = math.exp %271 : vector<2x128xf32>
    %273 = arith.addf %262, %272 : vector<2x128xf32>
    %274 = arith.addf %263, %271 : vector<2x128xf32>
    %c3_i32_175 = arith.constant 3 : i32
    %275 = vector.broadcast %c3_i32_175 : i32 to vector<2x128xi32>
    %276 = arith.cmpi eq, %181, %275 : vector<2x128xi32>
    %cst_176 = arith.constant 0.000000e+00 : f32
    %277 = vector.broadcast %cst_176 : f32 to vector<2x128xf32>
    %278 = arith.select %276, %271, %277 : vector<2x128xi1>, vector<2x128xf32>
    %279 = arith.addf %268, %278 : vector<2x128xf32>
    %c1_177 = arith.constant 1 : index
    %c4_178 = arith.constant 4 : index
    %c0_179 = arith.constant 0 : index
    %c0_180 = arith.constant 0 : index
    %280 = vector.load %arg2[%c1_177, %c4_178, %c0_179, %c0_180] : memref<2x9x2x128xf32, #tpu.memory_space<vmem>>, vector<1x1x2x128xf32>
    %281 = vector.shape_cast %280 : vector<1x1x2x128xf32> to vector<2x128xf32>
    %282 = arith.subf %281, %230 : vector<2x128xf32>
    %283 = math.exp %282 : vector<2x128xf32>
    %284 = arith.addf %273, %283 : vector<2x128xf32>
    %285 = arith.addf %274, %282 : vector<2x128xf32>
    %c4_i32_181 = arith.constant 4 : i32
    %286 = vector.broadcast %c4_i32_181 : i32 to vector<2x128xi32>
    %287 = arith.cmpi eq, %181, %286 : vector<2x128xi32>
    %cst_182 = arith.constant 0.000000e+00 : f32
    %288 = vector.broadcast %cst_182 : f32 to vector<2x128xf32>
    %289 = arith.select %287, %282, %288 : vector<2x128xi1>, vector<2x128xf32>
    %290 = arith.addf %279, %289 : vector<2x128xf32>
    %c1_183 = arith.constant 1 : index
    %c5_184 = arith.constant 5 : index
    %c0_185 = arith.constant 0 : index
    %c0_186 = arith.constant 0 : index
    %291 = vector.load %arg2[%c1_183, %c5_184, %c0_185, %c0_186] : memref<2x9x2x128xf32, #tpu.memory_space<vmem>>, vector<1x1x2x128xf32>
    %292 = vector.shape_cast %291 : vector<1x1x2x128xf32> to vector<2x128xf32>
    %293 = arith.subf %292, %230 : vector<2x128xf32>
    %294 = math.exp %293 : vector<2x128xf32>
    %295 = arith.addf %284, %294 : vector<2x128xf32>
    %296 = arith.addf %285, %293 : vector<2x128xf32>
    %c5_i32_187 = arith.constant 5 : i32
    %297 = vector.broadcast %c5_i32_187 : i32 to vector<2x128xi32>
    %298 = arith.cmpi eq, %181, %297 : vector<2x128xi32>
    %cst_188 = arith.constant 0.000000e+00 : f32
    %299 = vector.broadcast %cst_188 : f32 to vector<2x128xf32>
    %300 = arith.select %298, %293, %299 : vector<2x128xi1>, vector<2x128xf32>
    %301 = arith.addf %290, %300 : vector<2x128xf32>
    %c1_189 = arith.constant 1 : index
    %c6_190 = arith.constant 6 : index
    %c0_191 = arith.constant 0 : index
    %c0_192 = arith.constant 0 : index
    %302 = vector.load %arg2[%c1_189, %c6_190, %c0_191, %c0_192] : memref<2x9x2x128xf32, #tpu.memory_space<vmem>>, vector<1x1x2x128xf32>
    %303 = vector.shape_cast %302 : vector<1x1x2x128xf32> to vector<2x128xf32>
    %304 = arith.subf %303, %230 : vector<2x128xf32>
    %305 = math.exp %304 : vector<2x128xf32>
    %306 = arith.addf %295, %305 : vector<2x128xf32>
    %307 = arith.addf %296, %304 : vector<2x128xf32>
    %c6_i32_193 = arith.constant 6 : i32
    %308 = vector.broadcast %c6_i32_193 : i32 to vector<2x128xi32>
    %309 = arith.cmpi eq, %181, %308 : vector<2x128xi32>
    %cst_194 = arith.constant 0.000000e+00 : f32
    %310 = vector.broadcast %cst_194 : f32 to vector<2x128xf32>
    %311 = arith.select %309, %304, %310 : vector<2x128xi1>, vector<2x128xf32>
    %312 = arith.addf %301, %311 : vector<2x128xf32>
    %c1_195 = arith.constant 1 : index
    %c7_196 = arith.constant 7 : index
    %c0_197 = arith.constant 0 : index
    %c0_198 = arith.constant 0 : index
    %313 = vector.load %arg2[%c1_195, %c7_196, %c0_197, %c0_198] : memref<2x9x2x128xf32, #tpu.memory_space<vmem>>, vector<1x1x2x128xf32>
    %314 = vector.shape_cast %313 : vector<1x1x2x128xf32> to vector<2x128xf32>
    %315 = arith.subf %314, %230 : vector<2x128xf32>
    %316 = math.exp %315 : vector<2x128xf32>
    %317 = arith.addf %306, %316 : vector<2x128xf32>
    %318 = arith.addf %307, %315 : vector<2x128xf32>
    %c7_i32_199 = arith.constant 7 : i32
    %319 = vector.broadcast %c7_i32_199 : i32 to vector<2x128xi32>
    %320 = arith.cmpi eq, %181, %319 : vector<2x128xi32>
    %cst_200 = arith.constant 0.000000e+00 : f32
    %321 = vector.broadcast %cst_200 : f32 to vector<2x128xf32>
    %322 = arith.select %320, %315, %321 : vector<2x128xi1>, vector<2x128xf32>
    %323 = arith.addf %312, %322 : vector<2x128xf32>
    %c1_201 = arith.constant 1 : index
    %c8_202 = arith.constant 8 : index
    %c0_203 = arith.constant 0 : index
    %c0_204 = arith.constant 0 : index
    %324 = vector.load %arg2[%c1_201, %c8_202, %c0_203, %c0_204] : memref<2x9x2x128xf32, #tpu.memory_space<vmem>>, vector<1x1x2x128xf32>
    %325 = vector.shape_cast %324 : vector<1x1x2x128xf32> to vector<2x128xf32>
    %326 = arith.subf %325, %230 : vector<2x128xf32>
    %327 = math.exp %326 : vector<2x128xf32>
    %328 = arith.addf %317, %327 : vector<2x128xf32>
    %329 = arith.addf %318, %326 : vector<2x128xf32>
    %c8_i32_205 = arith.constant 8 : i32
    %330 = vector.broadcast %c8_i32_205 : i32 to vector<2x128xi32>
    %331 = arith.cmpi eq, %181, %330 : vector<2x128xi32>
    %cst_206 = arith.constant 0.000000e+00 : f32
    %332 = vector.broadcast %cst_206 : f32 to vector<2x128xf32>
    %333 = arith.select %331, %326, %332 : vector<2x128xi1>, vector<2x128xf32>
    %334 = arith.addf %323, %333 : vector<2x128xf32>
    %335 = math.log %328 : vector<2x128xf32>
    %cst_207 = arith.constant 0.899999976 : f32
    %336 = vector.broadcast %cst_207 : f32 to vector<2x128xf32>
    %337 = arith.mulf %336, %334 : vector<2x128xf32>
    %338 = arith.subf %335, %337 : vector<2x128xf32>
    %cst_208 = arith.constant 0.0111111114 : f32
    %339 = vector.broadcast %cst_208 : f32 to vector<2x128xf32>
    %340 = arith.mulf %339, %329 : vector<2x128xf32>
    %341 = arith.subf %338, %340 : vector<2x128xf32>
    %342 = arith.cmpi eq, %232, %181 : vector<2x128xi32>
    %343 = arith.extui %342 : vector<2x128xi1> to vector<2x128xi32>
    %344 = arith.sitofp %343 : vector<2x128xi32> to vector<2x128xf32>
    %c1_209 = arith.constant 1 : index
    %c0_210 = arith.constant 0 : index
    %c0_211 = arith.constant 0 : index
    %345 = vector.load %arg4[%c1_209, %c0_210, %c0_211] : memref<2x2x128xf32, #tpu.memory_space<vmem>>, vector<1x2x128xf32>
    %346 = vector.shape_cast %345 : vector<1x2x128xf32> to vector<2x128xf32>
    %347 = arith.addf %346, %341 : vector<2x128xf32>
    %c1_212 = arith.constant 1 : index
    %c0_213 = arith.constant 0 : index
    %c0_214 = arith.constant 0 : index
    %348 = vector.load %arg4[%c1_212, %c0_213, %c0_214] : memref<2x2x128xf32, #tpu.memory_space<vmem>>, vector<1x2x128xf32>
    %349 = vector.shape_cast %348 : vector<1x2x128xf32> to vector<2x128xf32>
    %350 = vector.shape_cast %347 : vector<2x128xf32> to vector<1x2x128xf32>
    tpu.vector_store %arg4[%c1_212, %c0_213, %c0_214], %350 {strides = array<i32>} : memref<2x2x128xf32, #tpu.memory_space<vmem>>, vector<1x2x128xf32>,
    %c1_215 = arith.constant 1 : index
    %c0_216 = arith.constant 0 : index
    %c0_217 = arith.constant 0 : index
    %351 = vector.load %arg5[%c1_215, %c0_216, %c0_217] : memref<2x2x128xf32, #tpu.memory_space<vmem>>, vector<1x2x128xf32>
    %352 = vector.shape_cast %351 : vector<1x2x128xf32> to vector<2x128xf32>
    %353 = arith.addf %352, %344 : vector<2x128xf32>
    %c1_218 = arith.constant 1 : index
    %c0_219 = arith.constant 0 : index
    %c0_220 = arith.constant 0 : index
    %354 = vector.load %arg5[%c1_218, %c0_219, %c0_220] : memref<2x2x128xf32, #tpu.memory_space<vmem>>, vector<1x2x128xf32>
    %355 = vector.shape_cast %354 : vector<1x2x128xf32> to vector<2x128xf32>
    %356 = vector.shape_cast %353 : vector<2x128xf32> to vector<1x2x128xf32>
    tpu.vector_store %arg5[%c1_218, %c0_219, %c0_220], %356 {strides = array<i32>} : memref<2x2x128xf32, #tpu.memory_space<vmem>>, vector<1x2x128xf32>,
    return
  }
  func.func @transform_0(%arg0: i32, %arg1: i32) -> (i32, i32, i32, i32) {
    %c0_i32 = arith.constant 0 : i32
    %c0_i32_0 = arith.constant 0 : i32
    %c0_i32_1 = arith.constant 0 : i32
    return %arg0, %c0_i32, %arg1, %c0_i32_0 : i32, i32, i32, i32
  }
  func.func @transform_1(%arg0: i32, %arg1: i32) -> (i32, i32, i32) {
    %c0_i32 = arith.constant 0 : i32
    %c0_i32_0 = arith.constant 0 : i32
    return %arg0, %arg1, %c0_i32 : i32, i32, i32
  }
  func.func @transform_2(%arg0: i32, %arg1: i32) -> (i32, i32, i32) {
    %c0_i32 = arith.constant 0 : i32
    %c0_i32_0 = arith.constant 0 : i32
    %c0_i32_1 = arith.constant 0 : i32
    return %arg0, %c0_i32, %c0_i32_0 : i32, i32, i32
  }
  func.func @transform_3(%arg0: i32, %arg1: i32) -> (i32, i32, i32) {
    %c0_i32 = arith.constant 0 : i32
    %c0_i32_0 = arith.constant 0 : i32
    %c0_i32_1 = arith.constant 0 : i32
    return %arg0, %c0_i32, %c0_i32_0 : i32, i32, i32
  }
}

</mosaic_0001>

<bundles_post_ra>
// kernel: _pixels_cls_loss_pallas.1
= control target key start
LH: loop header
LB: loop body
LE: loop exit
PB: predicated region body
PF: predicated region fallthrough
CT: control target
= control target key end

     0   :  { %v357_v0 = vmov 0.0   ;;  %v358_v11 = vmov 0   ;;  %s715_s2 = inlined_call_operand.vmem [shape: f32[2,2,128], index: 2, kind: output, shape index: {0}]   ;;  %s716_s3 = inlined_call_operand.vmem [shape: f32[2,2,128], index: 3, kind: output, shape index: {1}]   ;;  %s717_s0 = inlined_call_operand.vmem [shape: f32[2,9,2,128], index: 0, kind: input, shape index: {}]   ;;  %s718_s1 = inlined_call_operand.vmem [shape: s32[2,2,128], index: 1, kind: input, shape index: {}]  }
   0x1   :  { %17 = vst [vmem:[%s715_s2] sm:$0x3] %v357_v0  ;;  %18 = vst [vmem:[%s715_s2 + $0x2] sm:$0x3] %v357_v0  ;;  %v22_v1 = vld [vmem:[%s717_s0] sm:$0x3] }
   0x2   :  { %19 = vst [vmem:[%s716_s3] sm:$0x3] %v357_v0  ;;  %20 = vst [vmem:[%s716_s3 + $0x2] sm:$0x3] %v357_v0  ;;  %v291_v2 = vld [vmem:[%s717_s0 + $0x2] sm:$0x3] }
   0x3   :  { %vm25_vm0 = vcmp.gt.f32.partialorder %v291_v2, %v22_v1  ;;  %v292_v3 = vld [vmem:[%s717_s0 + $0x4] sm:$0x3]  ;;  %v293_v5 = vld [vmem:[%s717_s0 + $0x6] sm:$0x3]  ;;  %v294_v7 = vld [vmem:[%s717_s0 + $0x8] sm:$0x3] }
   0x4   :  { %v26_v4 = vsel %vm25_vm0, %v291_v2, %v22_v1  ;;  %v295_v8 = vld [vmem:[%s717_s0 + $0xa] sm:$0x3]  ;;  %v416_v9 = vld [vmem:[%s717_s0 + $0x12] sm:$0x3]  ;;  %v27_v12 = vsel %vm25_vm0, 1, %v358_v11 }
   0x5   :  { %vm30_vm1 = vcmp.gt.f32.partialorder %v292_v3, %v26_v4  ;;  %v422_v13 = vld [vmem:[%s717_s0 + $0x14] sm:$0x3]  ;;  %v427_v14 = vld [vmem:[%s717_s0 + $0x16] sm:$0x3]  ;;  %v296_v17 = vld [vmem:[%s717_s0 + $0xc] sm:$0x3] }
   0x6   :  { %v31_v6 = vsel %vm30_vm1, %v292_v3, %v26_v4  ;;  %v32_v15 = vsel %vm30_vm1, 2, %v27_v12  ;;  %vm156_vm4 = vcmp.gt.f32.partialorder %v422_v13, %v416_v9  ;;  %v444_v20 = vld [vmem:[%s717_s0 + $0x18] sm:$0x3]  ;;  %v297_v22 = vld [vmem:[%s717_s0 + $0xe] sm:$0x3] }
   0x7   :  { %vm35_vm2 = vcmp.gt.f32.partialorder %v293_v5, %v31_v6  ;;  %v439_v19 = vsel %vm156_vm4, %v422_v13, %v416_v9  ;;  %v461_v25 = vld [vmem:[%s717_s0 + $0x1a] sm:$0x3]  ;;  %v298_v27 = vld [vmem:[%s717_s0 + $0x10] sm:$0x3]  ;;  %v481_v31 = vld [vmem:[%s718_s1] sm:$0x3] }
   0x8   :  { %v36_v10 = vsel %vm35_vm2, %v293_v5, %v31_v6  ;;  %v37_v18 = vsel %vm35_vm2, 3, %v32_v15  ;;  %vm161_vm6 = vcmp.gt.f32.partialorder %v427_v14, %v439_v19  ;;  %v496_v39 = vld [vmem:[%s717_s0 + $0x1c] sm:$0x3]  ;;  %vm68_vm12 = vcmp.eq.s32.totalorder %v481_v31, 0  ;;  %v523_v53 = vld [vmem:[%s717_s0 + $0x1e] sm:$0x3] }
   0x9   :  { %vm40_vm3 = vcmp.gt.f32.partialorder %v294_v7, %v36_v10  ;;  %v456_v24 = vsel %vm161_vm6, %v427_v14, %v439_v19  ;;  %vm76_vm13 = vcmp.eq.s32.totalorder %v481_v31, 1  ;;  %vm84_vm15 = vcmp.eq.s32.totalorder %v481_v31, 2  ;;  %v147_v59 = vld [vmem:[%s716_s3] sm:$0x3]  ;;  %v552_v4 = vld [vmem:[%s718_s1 + $0x2] sm:$0x3] }
   0xa   :  { %v41_v16 = vsel %vm40_vm3, %v294_v7, %v36_v10  ;;  %v42_v23 = vsel %vm40_vm3, 4, %v37_v18  ;;  %vm166_vm8 = vcmp.gt.f32.partialorder %v444_v20, %v456_v24  ;;  %v158_v60 = vsel %vm156_vm4, 1, %v358_v11  ;;  %v546_v63 = vld [vmem:[%s717_s0 + $0x20] sm:$0x3] }
   0xb   :  { %vm45_vm5 = vcmp.gt.f32.partialorder %v295_v8, %v41_v16  ;;  %v473_v28 = vsel %vm166_vm8, %v444_v20, %v456_v24  ;;  %vm92_vm2 = vcmp.eq.s32.totalorder %v481_v31, 3  ;;  %vm100_vm3 = vcmp.eq.s32.totalorder %v481_v31, 4 }
   0xc   :  { %v46_v21 = vsel %vm45_vm5, %v295_v8, %v41_v16  ;;  %v47_v29 = vsel %vm45_vm5, 5, %v42_v23  ;;  %vm171_vm10 = vcmp.gt.f32.partialorder %v461_v25, %v473_v28  ;;  %vm108_vm5 = vcmp.eq.s32.totalorder %v481_v31, 5 }
   0xd   :  { %vm50_vm7 = vcmp.gt.f32.partialorder %v296_v17, %v46_v21  ;;  %v489_v34 = vsel %vm171_vm10, %v461_v25, %v473_v28 }
   0xe   :  { %v51_v26 = vsel %vm50_vm7, %v296_v17, %v46_v21  ;;  %v52_v33 = vsel %vm50_vm7, 6, %v47_v29  ;;  %vm176_vm14 = vcmp.gt.f32.partialorder %v496_v39, %v489_v34  ;;  %vm116_vm7 = vcmp.eq.s32.totalorder %v481_v31, 6 }
   0xf   :  { %vm55_vm9 = vcmp.gt.f32.partialorder %v297_v22, %v51_v26  ;;  %v518_v52 = vsel %vm176_vm14, %v496_v39, %v489_v34 }
  0x10   :  { %v56_v30 = vsel %vm55_vm9, %v297_v22, %v51_v26  ;;  %v57_v43 = vsel %vm55_vm9, 7, %v52_v33  ;;  %vm181_vm1 = vcmp.gt.f32.partialorder %v523_v53, %v518_v52 }
  0x11   :  { %vm60_vm11 = vcmp.gt.f32.partialorder %v298_v27, %v56_v30  ;;  %v560_v6 = vsel %vm181_vm1, %v523_v53, %v518_v52 }
  0x12   :  { %v61_v32 = vsel %vm60_vm11, %v298_v27, %v56_v30  ;;  %v62_v51 = vsel %vm60_vm11, 8, %v57_v43  ;;  %vm186_vm4 = vcmp.gt.f32.partialorder %v546_v63, %v560_v6  ;;  %vm207_vm11 = vcmp.eq.s32.totalorder %v552_v4, 1 }
  0x13   :  { %v63_v35 = vsub.f32 %v22_v1, %v61_v32  ;;  %v71_v36 = vsub.f32 %v291_v2, %v61_v32  ;;  %v79_v37 = vsub.f32 %v292_v3, %v61_v32  ;;  %v491_v38 = vsub.f32 %v293_v5, %v61_v32 }
  0x14   :  { %v499_v40 = vsub.f32 %v294_v7, %v61_v32  ;;  %v504_v46 = vsub.f32 %v295_v8, %v61_v32  ;;  %v509_v47 = vsub.f32 %v296_v17, %v61_v32  ;;  %v526_v55 = vsub.f32 %v297_v22, %v61_v32  ;;  %v565_v7 = vld [vmem:[%s717_s0 + $0x22] sm:$0x3] }
  0x15   :  { %v64_v41 = vmul.f32 1.442695, %v63_v35  ;;  %v72_v42 = vmul.f32 1.442695, %v71_v36  ;;  %v80_v44 = vmul.f32 1.442695, %v79_v37  ;;  %v536_v61 = vsub.f32 %v298_v27, %v61_v32 }
  0x16   :  { %v88_v45 = vmul.f32 1.442695, %v491_v38  ;;  %v69_v48 = vsel %vm68_vm12, %v63_v35, 0.0  ;;  %v77_v49 = vsel %vm76_vm13, %v71_v36, 0.0  ;;  %v96_v50 = vmul.f32 1.442695, %v499_v40 }
  0x17   :  { %317 = vpow2.f32 %v64_v41  ;;  %v104_v54 = vmul.f32 1.442695, %v504_v46  ;;  %v78_v56 = vadd.f32 %v77_v49, %v69_v48  ;;  %v85_v57 = vsel %vm84_vm15, %v79_v37, 0.0 }
  0x18   :  { %319 = vpow2.f32 %v72_v42  ;;  %v112_v58 = vmul.f32 1.442695, %v509_v47  ;;  %vm141_vm0 = vcmp.eq.s32.totalorder %v62_v51, %v481_v31  ;;  %v75_v1 = vadd.f32 %v71_v36, %v63_v35 }
  0x19   :  { %321 = vpow2.f32 %v80_v44  ;;  %v299_v62 = vsel %vm141_vm0, 1.0, %v357_v0  ;;  %v120_v2 = vmul.f32 1.442695, %v526_v55  ;;  %v86_v5 = vadd.f32 %v85_v57, %v78_v56 }
  0x1a   :  { %323 = vpow2.f32 %v88_v45  ;;  %v148_v3 = vadd.f32 %v299_v62, %v147_v59  ;;  %v163_v8 = vsel %vm161_vm6, 2, %v158_v60  ;;  %v93_v10 = vsel %vm92_vm2, %v491_v38, 0.0 }
  0x1b   :  { %325 = vpow2.f32 %v96_v50  ;;  %v128_v11 = vmul.f32 1.442695, %v536_v61  ;;  %v584_v15 = vsel %vm186_vm4, %v546_v63, %v560_v6  ;;  %vm199_vm6 = vcmp.eq.s32.totalorder %v552_v4, 0 }
  0x1c   :  { %327 = vpow2.f32 %v104_v54  ;;  %149 = vst [vmem:[%s716_s3] sm:$0x3] %v148_v3  ;;  %v83_v17 = vadd.f32 %v79_v37, %v75_v1  ;;  %vm191_vm9 = vcmp.gt.f32.partialorder %v565_v7, %v584_v15  ;;  %v168_v18 = vsel %vm166_vm8, 3, %v163_v8 }
  0x1d   :  { %329 = vpow2.f32 %v112_v58  ;;  %v94_v22 = vadd.f32 %v93_v10, %v86_v5  ;;  %v192_v23 = vsel %vm191_vm9, %v565_v7, %v584_v15  ;;  %v101_v32 = vsel %vm100_vm3, %v499_v40, 0.0 }
  0x1e   :  { %331 = vpow2.f32 %v120_v2  ;;  %v194_v27 = vsub.f32 %v416_v9, %v192_v23  ;;  %v202_v29 = vsub.f32 %v422_v13, %v192_v23  ;;  %v601_v24 = vsub.f32 %v427_v14, %v192_v23 }
  0x1f   :  { %333 = vpow2.f32 %v128_v11  ;;  %vm124_vm8 = vcmp.eq.s32.totalorder %v481_v31, 7  ;;  %v608_v33 = vsub.f32 %v444_v20, %v192_v23  ;;  %v173_v35 = vsel %vm171_vm10, 4, %v168_v18 }
  0x20   :  { %v91_v13 = vadd.f32 %v491_v38, %v83_v17  ;;  %v195_v36 = vmul.f32 1.442695, %v194_v27  ;;  %v203_v14 = vmul.f32 1.442695, %v202_v29  ;;  %v615_v37 = vsub.f32 %v461_v25, %v192_v23 }
  0x21   :  { %v318_v12 = vpop.eup %317  ;;  %v109_v42 = vsel %vm108_vm5, %v504_v46, 0.0  ;;  %v211_v20 = vmul.f32 1.442695, %v601_v24  ;;  %vm215_vm12 = vcmp.eq.s32.totalorder %v552_v4, 2  ;;  %v102_v28 = vadd.f32 %v101_v32, %v94_v22 }
  0x22   :  { %v320_v16 = vpop.eup %319  ;;  %335 = vpow2.f32 %v195_v36  ;;  %v200_v38 = vsel %vm199_vm6, %v194_v27, 0.0  ;;  %v178_v25 = vsel %vm176_vm14, 5, %v173_v35  ;;  %v208_v45 = vsel %vm207_vm11, %v202_v29, 0.0 }
  0x23   :  { %v322_v19 = vpop.eup %321  ;;  %v74_v21 = vadd.f32 %v320_v16, %v318_v12  ;;  %337 = vpow2.f32 %v203_v14  ;;  %v219_v48 = vmul.f32 1.442695, %v608_v33  ;;  %v99_v50 = vadd.f32 %v499_v40, %v91_v13 }
  0x24   :  { %v324_v26 = vpop.eup %323  ;;  %339 = vpow2.f32 %v211_v20  ;;  %vm223_vm10 = vcmp.eq.s32.totalorder %v552_v4, 3  ;;  %v227_v51 = vmul.f32 1.442695, %v615_v37  ;;  %v634_v34 = vsub.f32 %v496_v39, %v192_v23 }
  0x25   :  { %v82_v30 = vadd.f32 %v322_v19, %v74_v21  ;;  %v326_v9 = vpop.eup %325  ;;  %341 = vpow2.f32 %v219_v48  ;;  %v183_v56 = vsel %vm181_vm1, 6, %v178_v25  ;;  %v110_v58 = vadd.f32 %v109_v42, %v102_v28 }
  0x26   :  { %v328_v43 = vpop.eup %327  ;;  %v117_v40 = vsel %vm116_vm7, %v509_v47, 0.0  ;;  %v209_v59 = vadd.f32 %v208_v45, %v200_v38  ;;  %v643_v60 = vsub.f32 %v523_v53, %v192_v23  ;;  %343 = vpow2.f32 %v227_v51 }
  0x27   :  { %v90_v41 = vadd.f32 %v324_v26, %v82_v30  ;;  %v330_v49 = vpop.eup %329  ;;  %v235_v1 = vmul.f32 1.442695, %v634_v34  ;;  %v647_v39 = vsub.f32 %v546_v63, %v192_v23  ;;  %v107_v52 = vadd.f32 %v504_v46, %v99_v50 }
  0x28   :  { %v332_v57 = vpop.eup %331  ;;  %v216_v3 = vsel %vm215_vm12, %v601_v24, 0.0  ;;  %v243_v5 = vmul.f32 1.442695, %v643_v60  ;;  %v188_v53 = vsel %vm186_vm4, 7, %v183_v56  ;;  %v206_v10 = vadd.f32 %v202_v29, %v194_v27 }
  0x29   :  { %v98_v44 = vadd.f32 %v326_v9, %v90_v41  ;;  %v334_v2 = vpop.eup %333  ;;  %345 = vpow2.f32 %v235_v1  ;;  %v251_v11 = vmul.f32 1.442695, %v647_v39  ;;  %v118_v12 = vadd.f32 %v117_v40, %v110_v58 }
  0x2a   :  { %v125_v46 = vsel %vm124_vm8, %v526_v55, 0.0  ;;  %vm132_vm13 = vcmp.eq.s32.totalorder %v481_v31, 8  ;;  %v663_v16 = vsub.f32 %v565_v7, %v192_v23  ;;  %v217_v18 = vadd.f32 %v216_v3, %v209_v59  ;;  %v313_v7 = vld [vmem:[%s716_s3 + $0x2] sm:$0x3] }
  0x2b   :  { %v106_v54 = vadd.f32 %v328_v43, %v98_v44  ;;  %347 = vpow2.f32 %v243_v5  ;;  %v193_v63 = vsel %vm191_vm9, 8, %v188_v53  ;;  %v115_v19 = vadd.f32 %v509_v47, %v107_v52 }
  0x2c   :  { %v336_v6 = vpop.eup %335  ;;  %v224_v21 = vsel %vm223_vm10, %v608_v33, 0.0  ;;  %349 = vpow2.f32 %v251_v11  ;;  %v259_v22 = vmul.f32 1.442695, %v663_v16  ;;  %v214_v23 = vadd.f32 %v601_v24, %v206_v10 }
  0x2d   :  { %v114_v62 = vadd.f32 %v330_v49, %v106_v54  ;;  %v338_v26 = vpop.eup %337  ;;  %vm231_vm14 = vcmp.eq.s32.totalorder %v552_v4, 4  ;;  %vm272_vm15 = vcmp.eq.s32.totalorder %v193_v63, %v552_v4  ;;  %v126_v15 = vadd.f32 %v125_v46, %v118_v12 }
  0x2e   :  { %v340_v47 = vpop.eup %339  ;;  %v205_v27 = vadd.f32 %v338_v26, %v336_v6  ;;  %v133_v30 = vsel %vm132_vm13, %v536_v61, 0.0  ;;  %v225_v32 = vadd.f32 %v224_v21, %v217_v18  ;;  %v310_v24 = vsel %vm272_vm15, 1.0, %v357_v0 }
  0x2f   :  { %v122_v8 = vadd.f32 %v332_v57, %v114_v62  ;;  %v342_v29 = vpop.eup %341  ;;  %v123_v35 = vadd.f32 %v526_v55, %v115_v19  ;;  %v232_v13 = vsel %vm231_vm14, %v615_v37, 0.0  ;;  %v281_v36 = vadd.f32 %v313_v7, %v310_v24 }
  0x30   :  { %v213_v9 = vadd.f32 %v340_v47, %v205_v27  ;;  %v344_v14 = vpop.eup %343  ;;  %v222_v41 = vadd.f32 %v608_v33, %v214_v23  ;;  %vm239_vm0 = vcmp.eq.s32.totalorder %v552_v4, 5  ;;  %v134_v42 = vadd.f32 %v133_v30, %v126_v15 }
  0x31   :  { %v130_v17 = vadd.f32 %v334_v2, %v122_v8  ;;  %314 = vst [vmem:[%s716_s3 + $0x2] sm:$0x3] %v281_v36  ;;  %v233_v43 = vadd.f32 %v232_v13, %v225_v32  ;;  %v131_v0 = vadd.f32 %v536_v61, %v123_v35  ;;  %v240_v28 = vsel %vm239_vm0, %v634_v34, 0.0 }
  0x32   :  { %v221_v20 = vadd.f32 %v342_v29, %v213_v9  ;;  %v230_v25 = vadd.f32 %v615_v37, %v222_v41  ;;  %vm247_vm1 = vcmp.eq.s32.totalorder %v552_v4, 6  ;;  %v137_v44 = vmul.f32 0.9, %v134_v42  ;;  %v144_v37 = vld [vmem:[%s715_s2] sm:$0x3] }
  0x33   :  { %351 = vlog2.f32 %v130_v17  ;;  %v346_v31 = vpop.eup %345  ;;  %v241_v49 = vadd.f32 %v240_v28, %v233_v43  ;;  %v139_v51 = vmul.f32 0.011111111, %v131_v0  ;;  %v248_v56 = vsel %vm247_vm1, %v643_v60, 0.0 }
  0x34   :  { %353 = vpow2.f32 %v259_v22  ;;  %v229_v55 = vadd.f32 %v344_v14, %v221_v20  ;;  %v238_v61 = vadd.f32 %v634_v34, %v230_v25  ;;  %vm255_vm2 = vcmp.eq.s32.totalorder %v552_v4, 7 }
  0x35   :  { %v348_v38 = vpop.eup %347  ;;  %v249_v59 = vadd.f32 %v248_v56, %v241_v49  ;;  %v256_v1 = vsel %vm255_vm2, %v647_v39, 0.0  ;;  %vm263_vm3 = vcmp.eq.s32.totalorder %v552_v4, 8  ;;  %v311_v4 = vld [vmem:[%s715_s2 + $0x2] sm:$0x3] }
  0x36   :  { %v350_v33 = vpop.eup %349  ;;  %v237_v45 = vadd.f32 %v346_v31, %v229_v55  ;;  %v246_v52 = vadd.f32 %v643_v60, %v238_v61  ;;  %v264_v5 = vsel %vm263_vm3, %v663_v16, 0.0 }
  0x37   :  { %v257_v34 = vadd.f32 %v256_v1, %v249_v59 }
  0x38   :  { %v245_v54 = vadd.f32 %v348_v38, %v237_v45  ;;  %v254_v53 = vadd.f32 %v647_v39, %v246_v52 }
  0x39   :  { %v265_v8 = vadd.f32 %v264_v5, %v257_v34 }
  0x3a   :  { %v253_v40 = vadd.f32 %v350_v33, %v245_v54  ;;  %v262_v10 = vadd.f32 %v663_v16, %v254_v53 }
  0x3b   :  { %v268_v11 = vmul.f32 0.9, %v265_v8 }
  0x3c   :  { %v270_v60 = vmul.f32 0.011111111, %v262_v10 }
  0x3d   :  { %v352_v48 = vpop.eup %351 }
  0x3e   :  { %v136_v50 = vmul.f32 0.6931472, %v352_v48  ;;  %v354_v57 = vpop.eup %353 }
  0x3f   :  { %v261_v2 = vadd.f32 %v354_v57, %v253_v40 }
  0x40   :  { %v138_v58 = vsub.f32 %v136_v50, %v137_v44 }
  0x41   :  { %355 = vlog2.f32 %v261_v2 }
  0x42   :  { %v140_v62 = vsub.f32 %v138_v58, %v139_v51 }
  0x44   :  { %v145_v3 = vadd.f32 %v144_v37, %v140_v62 }
  0x46   :  { %146 = vst [vmem:[%s715_s2] sm:$0x3] %v145_v3 }
  0x4b   :  { %v356_v12 = vpop.eup %355 }
  0x4c   :  { %v267_v46 = vmul.f32 0.6931472, %v356_v12 }
  0x4e   :  { %v269_v17 = vsub.f32 %v267_v46, %v268_v11 }
  0x50   :  { %v271_v18 = vsub.f32 %v269_v17, %v270_v60 }
  0x52   :  { %v277_v63 = vadd.f32 %v311_v4, %v271_v18 }
  0x54   :  { %312 = vst [vmem:[%s715_s2 + $0x2] sm:$0x3] %v277_v63 }

</bundles_post_ra>
